<compile_context>
chip_gen: v5e
topology: v5e:2x2
jax: 0.10.0
libtpu: 0.0.40
codegen_flags: <defaults>
</compile_context>

<pallas_src>
import functools

import jax
import jax.numpy as jnp
from jax.experimental import pallas as pl
from jax.experimental.pallas import tpu as pltpu

EPS = 1e-5
MOMENTUM = 0.9

_VMEM_LIMIT_BYTES = 32 * 1024 * 1024     # works on v5e / v6e / v7x
_BLOCK_BYTES_BUDGET = 4 * 1024 * 1024    # per x/y block (double-buffered by Pallas)
_FUSED_BYTES_LIMIT = 4 * 1024 * 1024     # x below this -> single fused kernel


def _pick_tile(total, unit, max_elems):
    """Largest t that divides `total`, with t <= max_elems and t % unit == 0.
    Falls back to the full extent (always layout-legal, possibly large)."""
    if total <= max_elems:
        return total
    t = (max_elems // unit) * unit
    while t >= unit:
        if total % t == 0:
            return t
        t -= unit
    return total


# --------------------------------------------------------------------------
# Kernels
# --------------------------------------------------------------------------
def _fused_kernel(x_ref, gamma_ref, beta_ref, mm_ref, mv_ref,
                  y_ref, new_mm_ref, new_mv_ref, *, reduce_axes, inv_m):
    """Single-pass BN: whole tensor resident in VMEM (small-input fast path)."""
    x = x_ref[...].astype(jnp.float32)
    mean = jnp.sum(x, axis=reduce_axes, keepdims=True) * inv_m
    d = x - mean
    var = jnp.sum(d * d, axis=reduce_axes, keepdims=True) * inv_m
    scale = gamma_ref[...] * jax.lax.rsqrt(var + EPS)
    y_ref[...] = (d * scale + beta_ref[...]).astype(y_ref.dtype)
    new_mm_ref[...] = MOMENTUM * mm_ref[...] + (1.0 - MOMENTUM) * mean
    new_mv_ref[...] = MOMENTUM * mv_ref[...] + (1.0 - MOMENTUM) * var


def _stats_kernel(x_ref, gamma_ref, beta_ref, mm_ref, mv_ref,
                  scale_ref, bias_ref, new_mm_ref, new_mv_ref,
                  sum_acc, sq_acc, *, reduce_axes, inv_m):
    """Accumulate per-channel sum / sum-of-squares; finalize on the last step."""
    i = pl.program_id(0)
    j = pl.program_id(1)

    @pl.when(jnp.logical_and(i == 0, j == 0))
    def _init():
        sum_acc[...] = jnp.zeros_like(sum_acc)
        sq_acc[...] = jnp.zeros_like(sq_acc)

    x = x_ref[...].astype(jnp.float32)     # no-op for f32 inputs
    sum_acc[...] += jnp.sum(x, axis=reduce_axes, keepdims=True)
    sq_acc[...] += jnp.sum(x * x, axis=reduce_axes, keepdims=True)

    last = jnp.logical_and(i == pl.num_programs(0) - 1,
                           j == pl.num_programs(1) - 1)

    @pl.when(last)
    def _finalize():
        mean = sum_acc[...] * inv_m
        # E[x^2] - mean^2 with f32 accumulators; clamp for safety.
        var = jnp.maximum(sq_acc[...] * inv_m - mean * mean, 0.0)
        scale = gamma_ref[...] * jax.lax.rsqrt(var + EPS)
        scale_ref[...] = scale
        bias_ref[...] = beta_ref[...] - mean * scale
        new_mm_ref[...] = MOMENTUM * mm_ref[...] + (1.0 - MOMENTUM) * mean
        new_mv_ref[...] = MOMENTUM * mv_ref[...] + (1.0 - MOMENTUM) * var


def _normalize_kernel(x_ref, scale_ref, bias_ref, y_ref):
    """y = x * scale + bias, with per-channel scale/bias broadcast."""
    x = x_ref[...].astype(jnp.float32)
    y = x * scale_ref[...] + bias_ref[...]
    y_ref[...] = y.astype(y_ref.dtype)


# --------------------------------------------------------------------------
# Launch helpers (shared by 2-D and 4-D paths)
# --------------------------------------------------------------------------
def _launch_fused(x, g, b, mm, mv, *, param_shape, reduce_axes, inv_m):
    fused = functools.partial(_fused_kernel,
                              reduce_axes=reduce_axes, inv_m=inv_m)
    param_out = jax.ShapeDtypeStruct(param_shape, jnp.float32)
    return pl.pallas_call(
        fused,
        out_shape=(jax.ShapeDtypeStruct(x.shape, x.dtype),
                   param_out, param_out),
        compiler_params=pltpu.CompilerParams(
            vmem_limit_bytes=_VMEM_LIMIT_BYTES),
    )(x, g, b, mm, mv)


def _launch_streaming(x, g, b, mm, mv, *, grid, x_spec, param_spec,
                      param_shape, reduce_axes, inv_m):
    stats = functools.partial(_stats_kernel,
                              reduce_axes=reduce_axes, inv_m=inv_m)
    param_out = jax.ShapeDtypeStruct(param_shape, jnp.float32)

    scale, bias, new_mm, new_mv = pl.pallas_call(
        stats,
        out_shape=(param_out, param_out, param_out, param_out),
        grid=grid,
        in_specs=[x_spec, param_spec, param_spec, param_spec, param_spec],
        out_specs=(param_spec, param_spec, param_spec, param_spec),
        scratch_shapes=[pltpu.VMEM(param_shape, jnp.float32),
                        pltpu.VMEM(param_shape, jnp.float32)],
        compiler_params=pltpu.CompilerParams(
            dimension_semantics=("arbitrary", "arbitrary"),
            vmem_limit_bytes=_VMEM_LIMIT_BYTES),
    )(x, g, b, mm, mv)

    y = pl.pallas_call(
        _normalize_kernel,
        out_shape=jax.ShapeDtypeStruct(x.shape, x.dtype),
        grid=grid,
        in_specs=[x_spec, param_spec, param_spec],
        out_specs=x_spec,
        compiler_params=pltpu.CompilerParams(
            dimension_semantics=("parallel", "parallel"),
            vmem_limit_bytes=_VMEM_LIMIT_BYTES),
    )(x, scale, bias)

    return y, new_mm, new_mv


# --------------------------------------------------------------------------
# Shape-specific wrappers
# --------------------------------------------------------------------------
def _bn_train_4d(X, gamma, beta, moving_mean, moving_var, fused_bytes_limit):
    N, C, H, W = X.shape
    HW = H * W
    x3 = X.reshape(N, C, HW)                       # free reshape, no transpose
    pshape = (1, C, 1)
    g = gamma.reshape(pshape).astype(jnp.float32)
    b = beta.reshape(pshape).astype(jnp.float32)
    mm = moving_mean.reshape(pshape).astype(jnp.float32)
    mv = moving_var.reshape(pshape).astype(jnp.float32)

    ebytes = X.dtype.itemsize
    inv_m = 1.0 / float(N * HW)

    if X.size * ebytes <= fused_bytes_limit:
        y3, new_mm, new_mv = _launch_fused(
            x3, g, b, mm, mv, param_shape=pshape,
            reduce_axes=(0, 2), inv_m=inv_m)
    else:
        thw = _pick_tile(HW, 128, max(_BLOCK_BYTES_BUDGET // (ebytes * C), 1))
        grid = (N, HW // thw)
        x_spec = pl.BlockSpec((1, C, thw), lambda i, j: (i, 0, j))
        param_spec = pl.BlockSpec(pshape, lambda i, j: (0, 0, 0))
        y3, new_mm, new_mv = _launch_streaming(
            x3, g, b, mm, mv,
            grid=grid, x_spec=x_spec, param_spec=param_spec,
            param_shape=pshape, reduce_axes=(0, 2), inv_m=inv_m)

    return (y3.reshape(N, C, H, W),
            new_mm.reshape(moving_mean.shape).astype(moving_mean.dtype),
            new_mv.reshape(moving_var.shape).astype(moving_var.dtype))


def _bn_train_2d(X, gamma, beta, moving_mean, moving_var, fused_bytes_limit):
    M, C = X.shape
    pshape = (1, C)
    g = gamma.reshape(pshape).astype(jnp.float32)
    b = beta.reshape(pshape).astype(jnp.float32)
    mm = moving_mean.reshape(pshape).astype(jnp.float32)
    mv = moving_var.reshape(pshape).astype(jnp.float32)

    ebytes = X.dtype.itemsize
    inv_m = 1.0 / float(M)

    if X.size * ebytes <= fused_bytes_limit:
        y, new_mm, new_mv = _launch_fused(
            X, g, b, mm, mv, param_shape=pshape,
            reduce_axes=(0,), inv_m=inv_m)
    else:
        tm = _pick_tile(M, 8, max(_BLOCK_BYTES_BUDGET // (ebytes * C), 1))
        grid = (M // tm, 1)
        x_spec = pl.BlockSpec((tm, C), lambda i, j: (i, 0))
        param_spec = pl.BlockSpec(pshape, lambda i, j: (0, 0))
        y, new_mm, new_mv = _launch_streaming(
            X, g, b, mm, mv,
            grid=grid, x_spec=x_spec, param_spec=param_spec,
            param_shape=pshape, reduce_axes=(0,), inv_m=inv_m)

    return (y,
            new_mm.reshape(moving_mean.shape).astype(moving_mean.dtype),
            new_mv.reshape(moving_var.shape).astype(moving_var.dtype))


def batch_norm_forward(X, gamma, beta, moving_mean, moving_var,
                       *, fused_bytes_limit=_FUSED_BYTES_LIMIT):
    """Training-mode BatchNorm forward matching the PyTorch `batch_norm` fn.

    X: (N, C) or (N, C, H, W) (NCHW).  Params: (1, C) or (1, C, 1, 1).
    Returns (Y, new_moving_mean, new_moving_var)."""
    assert X.ndim in (2, 4)
    if X.ndim == 2:
        return _bn_train_2d(X, gamma, beta, moving_mean, moving_var,
                            fused_bytes_limit)
    return _bn_train_4d(X, gamma, beta, moving_mean, moving_var,
                        fused_bytes_limit)


class BatchNormPallas:
    """Mirror of the PyTorch BatchNorm module (deterministic init)."""

    def __init__(self, num_features, num_dims):
        if num_dims == 2:
            shape = (1, num_features)
        else:
            shape = (1, num_features, 1, 1)
        self.gamma = jnp.ones(shape, jnp.float32)
        self.beta = jnp.zeros(shape, jnp.float32)
        self.moving_mean = jnp.zeros(shape, jnp.float32)
        self.moving_var = jnp.ones(shape, jnp.float32)

    def __call__(self, X):
        Y, self.moving_mean, self.moving_var = batch_norm_forward(
            X, self.gamma, self.beta, self.moving_mean, self.moving_var)
        return Y


# --------------------------------------------------------------------------
# Reference + test
# --------------------------------------------------------------------------
def _reference(X, gamma, beta, mm, mv):
    axes = (0,) if X.ndim == 2 else (0, 2, 3)
    mean = jnp.mean(X, axis=axes, keepdims=True)
    var = jnp.mean((X - mean) ** 2, axis=axes, keepdims=True)
    X_hat = (X - mean) / jnp.sqrt(var + EPS)
    Y = gamma * X_hat + beta
    new_mm = MOMENTUM * mm + (1.0 - MOMENTUM) * mean
    new_mv = MOMENTUM * mv + (1.0 - MOMENTUM) * var
    return Y, new_mm, new_mv


def _check(got, want, atol, rtol):
    assert jnp.allclose(got, want, atol=atol, rtol=rtol), (
        f"mismatch: max abs err {jnp.max(jnp.abs(got - want))}")


if __name__ == "__main__":
    key = jax.random.PRNGKey(0)
    k4, k2 = jax.random.split(key)

    # ---- 4-D (NCHW) path ----
    N, C, H, W = 2, 4, 16, 16
    X4 = jax.random.normal(k4, (N, C, H, W), dtype=jnp.float32)
    p4 = (jnp.ones((1, C, 1, 1)), jnp.zeros((1, C, 1, 1)),
          jnp.zeros((1, C, 1, 1)), jnp.ones((1, C, 1, 1)))
    Y4_ref, mm4_ref, mv4_ref = _reference(X4, *p4)

    # fused small-input path (via the module)
    bn4 = BatchNormPallas(num_features=C, num_dims=4)
    Y4 = jax.block_until_ready(bn4(X4))
    mm4 = jax.block_until_ready(bn4.moving_mean)
    mv4 = jax.block_until_ready(bn4.moving_var)
    _check(Y4, Y4_ref, 1e-4, 1e-4)
    _check(mm4, mm4_ref, 1e-5, 1e-5)
    _check(mv4, mv4_ref, 1e-5, 1e-5)

    # streaming two-pass path (forced)
    Y4s, mm4s, mv4s = batch_norm_forward(X4, *p4, fused_bytes_limit=0)
    jax.block_until_ready(Y4s)
    _check(Y4s, Y4_ref, 1e-4, 1e-4)
    _check(mm4s, mm4_ref, 1e-5, 1e-5)
    _check(mv4s, mv4_ref, 1e-5, 1e-5)

    # ---- 2-D (fully-connected) path ----
    M2, C2 = 8, 32
    X2 = jax.random.normal(k2, (M2, C2), dtype=jnp.float32)
    p2 = (jnp.ones((1, C2)), jnp.zeros((1, C2)),
          jnp.zeros((1, C2)), jnp.ones((1, C2)))
    Y2_ref, mm2_ref, mv2_ref = _reference(X2, *p2)

    bn2 = BatchNormPallas(num_features=C2, num_dims=2)
    Y2 = jax.block_until_ready(bn2(X2))
    mm2 = jax.block_until_ready(bn2.moving_mean)
    mv2 = jax.block_until_ready(bn2.moving_var)
    _check(Y2, Y2_ref, 1e-4, 1e-4)
    _check(mm2, mm2_ref, 1e-5, 1e-5)
    _check(mv2, mv2_ref, 1e-5, 1e-5)

    Y2s, mm2s, mv2s = batch_norm_forward(X2, *p2, fused_bytes_limit=0)
    jax.block_until_ready(Y2s)
    _check(Y2s, Y2_ref, 1e-4, 1e-4)
    _check(mm2s, mm2_ref, 1e-5, 1e-5)
    _check(mv2s, mv2_ref, 1e-5, 1e-5)

    print("KERNEL_OK")
</pallas_src>

<mosaic_0001>
module attributes {stable_mosaic.version = 11 : i64} {
  func.func @_fused_kernel(%arg0: memref<2x4x256xf32, #tpu.memory_space<vmem>>, %arg1: memref<1x4x1xf32, #tpu.memory_space<vmem>>, %arg2: memref<1x4x1xf32, #tpu.memory_space<vmem>>, %arg3: memref<1x4x1xf32, #tpu.memory_space<vmem>>, %arg4: memref<1x4x1xf32, #tpu.memory_space<vmem>>, %arg5: memref<2x4x256xf32, #tpu.memory_space<vmem>>, %arg6: memref<1x4x1xf32, #tpu.memory_space<vmem>>, %arg7: memref<1x4x1xf32, #tpu.memory_space<vmem>>) attributes {dimension_semantics = [], scalar_prefetch = 0 : i64, scratch_operands = 0 : i64, tpu.core_type = #tpu.core_type<tc>} {
    %c0 = arith.constant 0 : index
    %c0_0 = arith.constant 0 : index
    %c0_1 = arith.constant 0 : index
    %0 = vector.load %arg0[%c0, %c0_0, %c0_1] : memref<2x4x256xf32, #tpu.memory_space<vmem>>, vector<2x4x256xf32>
    %cst = arith.constant dense<0.000000e+00> : vector<4xf32>
    %1 = vector.multi_reduction <add>, %0, %cst [0, 2] : vector<2x4x256xf32> to vector<4xf32>
    %2 = vector.shape_cast %1 : vector<4xf32> to vector<1x4x1xf32>
    %cst_2 = arith.constant 0.001953125 : f32
    %3 = vector.broadcast %cst_2 : f32 to vector<1x4x1xf32>
    %4 = arith.mulf %2, %3 : vector<1x4x1xf32>
    %5 = vector.broadcast %4 : vector<1x4x1xf32> to vector<2x4x256xf32>
    %6 = arith.subf %0, %5 : vector<2x4x256xf32>
    %7 = arith.mulf %6, %6 : vector<2x4x256xf32>
    %cst_3 = arith.constant dense<0.000000e+00> : vector<4xf32>
    %8 = vector.multi_reduction <add>, %7, %cst_3 [0, 2] : vector<2x4x256xf32> to vector<4xf32>
    %9 = vector.shape_cast %8 : vector<4xf32> to vector<1x4x1xf32>
    %cst_4 = arith.constant 0.001953125 : f32
    %10 = vector.broadcast %cst_4 : f32 to vector<1x4x1xf32>
    %11 = arith.mulf %9, %10 : vector<1x4x1xf32>
    %c0_5 = arith.constant 0 : index
    %c0_6 = arith.constant 0 : index
    %c0_7 = arith.constant 0 : index
    %12 = vector.load %arg1[%c0_5, %c0_6, %c0_7] : memref<1x4x1xf32, #tpu.memory_space<vmem>>, vector<1x4x1xf32>
    %cst_8 = arith.constant 9.99999974E-6 : f32
    %13 = vector.broadcast %cst_8 : f32 to vector<1x4x1xf32>
    %14 = arith.addf %11, %13 : vector<1x4x1xf32>
    %15 = math.rsqrt %14 : vector<1x4x1xf32>
    %16 = arith.mulf %12, %15 : vector<1x4x1xf32>
    %17 = vector.broadcast %16 : vector<1x4x1xf32> to vector<2x4x256xf32>
    %18 = arith.mulf %6, %17 : vector<2x4x256xf32>
    %c0_9 = arith.constant 0 : index
    %c0_10 = arith.constant 0 : index
    %c0_11 = arith.constant 0 : index
    %19 = vector.load %arg2[%c0_9, %c0_10, %c0_11] : memref<1x4x1xf32, #tpu.memory_space<vmem>>, vector<1x4x1xf32>
    %20 = vector.broadcast %19 : vector<1x4x1xf32> to vector<2x4x256xf32>
    %21 = arith.addf %18, %20 : vector<2x4x256xf32>
    %c0_12 = arith.constant 0 : index
    %c0_13 = arith.constant 0 : index
    %c0_14 = arith.constant 0 : index
    %22 = vector.load %arg5[%c0_12, %c0_13, %c0_14] : memref<2x4x256xf32, #tpu.memory_space<vmem>>, vector<2x4x256xf32>
    tpu.vector_store %arg5[%c0_12, %c0_13, %c0_14], %21 {strides = array<i32>} : memref<2x4x256xf32, #tpu.memory_space<vmem>>, vector<2x4x256xf32>,
    %c0_15 = arith.constant 0 : index
    %c0_16 = arith.constant 0 : index
    %c0_17 = arith.constant 0 : index
    %23 = vector.load %arg3[%c0_15, %c0_16, %c0_17] : memref<1x4x1xf32, #tpu.memory_space<vmem>>, vector<1x4x1xf32>
    %cst_18 = arith.constant 0.899999976 : f32
    %24 = vector.broadcast %cst_18 : f32 to vector<1x4x1xf32>
    %25 = arith.mulf %24, %23 : vector<1x4x1xf32>
    %cst_19 = arith.constant 1.000000e-01 : f32
    %26 = vector.broadcast %cst_19 : f32 to vector<1x4x1xf32>
    %27 = arith.mulf %26, %4 : vector<1x4x1xf32>
    %28 = arith.addf %25, %27 : vector<1x4x1xf32>
    %c0_20 = arith.constant 0 : index
    %c0_21 = arith.constant 0 : index
    %c0_22 = arith.constant 0 : index
    %29 = vector.load %arg6[%c0_20, %c0_21, %c0_22] : memref<1x4x1xf32, #tpu.memory_space<vmem>>, vector<1x4x1xf32>
    tpu.vector_store %arg6[%c0_20, %c0_21, %c0_22], %28 {strides = array<i32>} : memref<1x4x1xf32, #tpu.memory_space<vmem>>, vector<1x4x1xf32>,
    %c0_23 = arith.constant 0 : index
    %c0_24 = arith.constant 0 : index
    %c0_25 = arith.constant 0 : index
    %30 = vector.load %arg4[%c0_23, %c0_24, %c0_25] : memref<1x4x1xf32, #tpu.memory_space<vmem>>, vector<1x4x1xf32>
    %cst_26 = arith.constant 0.899999976 : f32
    %31 = vector.broadcast %cst_26 : f32 to vector<1x4x1xf32>
    %32 = arith.mulf %31, %30 : vector<1x4x1xf32>
    %cst_27 = arith.constant 1.000000e-01 : f32
    %33 = vector.broadcast %cst_27 : f32 to vector<1x4x1xf32>
    %34 = arith.mulf %33, %11 : vector<1x4x1xf32>
    %35 = arith.addf %32, %34 : vector<1x4x1xf32>
    %c0_28 = arith.constant 0 : index
    %c0_29 = arith.constant 0 : index
    %c0_30 = arith.constant 0 : index
    %36 = vector.load %arg7[%c0_28, %c0_29, %c0_30] : memref<1x4x1xf32, #tpu.memory_space<vmem>>, vector<1x4x1xf32>
    tpu.vector_store %arg7[%c0_28, %c0_29, %c0_30], %35 {strides = array<i32>} : memref<1x4x1xf32, #tpu.memory_space<vmem>>, vector<1x4x1xf32>,
    return
  }
}

</mosaic_0001>

<bundles_post_ra>
// kernel: tpu_custom_call.1
= control target key start
LH: loop header
LB: loop body
LE: loop exit
PB: predicated region body
PF: predicated region fallthrough
CT: control target
= control target key end

     0   :  { %13 = vsyncpa [#allocation3], 0  ;;  %s323_s0 = inlined_call_operand.hbm [shape: f32[2,4,256], index: 0, kind: input, shape index: {}]   ;;  %s324_s1 = inlined_call_operand.vmem [shape: f32[1,4,1], index: 1, kind: input, shape index: {}]   ;;  %s325_s2 = inlined_call_operand.vmem [shape: f32[1,4,1], index: 2, kind: input, shape index: {}]   ;;  %s326_s3 = inlined_call_operand.vmem [shape: f32[1,4,1], index: 3, kind: input, shape index: {}]   ;;  %s327_s4 = inlined_call_operand.vmem [shape: f32[1,4,1], index: 4, kind: input, shape index: {}]   ;;  %s328_s5 = inlined_call_operand.hbm [shape: f32[2,4,256], index: 5, kind: output, shape index: {0}]   ;;  %s329_s6 = inlined_call_operand.vmem [shape: f32[1,4,1], index: 6, kind: output, shape index: {1}]   ;;  %s330_s7 = inlined_call_operand.vmem [shape: f32[1,4,1], index: 7, kind: output, shape index: {2}]  }
   0x1   :  { %14 = vsyncpa [#allocation4], 0  ;;  %s19_s26 = sshll.u32 %s323_s0, 4  ;;  %s237_s27 = smov [#allocation2]   ;;  %s20_s26 = int_to_ptr.hbm [resolvable:$true] %s19_s26 }
   0x2   :  { %s21_s28 = sshll.u32 %s237_s27, 4  ;;  %s238_s29 = smov 128   ;;  %s22_s28 = int_to_ptr.vmem [resolvable:$true] %s21_s28 }
   0x3   :  { %s239_s30 = smov 8  }
   0x4   :  { %27 = dma.hbm_to_vmem [thread:$0]  %s20_s26, 256, %s22_s28, [#allocation3], %s238_s29, %s238_s29, %s239_s30  }
   0x5   :  { %233 = dma.done.wait [#allocation3], 256  }
   0x6   :  { %234 = vsyncadd [#allocation3], 4294967040  ;;  %v40_v0 = vld [vmem:[#allocation2] sm:$0xff]  ;;  %v41_v1 = vld [vmem:[#allocation2 + $0x8] sm:$0xff]  ;;  %vm55_vm0 = vcmask 1043456   ;;  %vm141_vm1 = vcmask 3072  }
   0x7   :  { %44 = vst [vmem:[#allocation1] ss:$2 sm:$0xff] %v40_v0  ;;  %v240_v13 = vmov 839922192   ;;  %v137_v15 = vld [vmem:[%s326_s3] sm:$0xf] }
   0x8   :  { %48 = vst [vmem:[#allocation1 + $0x10] ss:$2 sm:$0xff] %v41_v1  ;;  %v68_v14 = vunpack.c.l.s4 %v240_v13  ;;  %v138_v18 = vmul.f32 0.9, %v137_v15  ;;  %v241_v38 = vmov 0   ;;  %s154_s18 = sshll.u32 %s328_s5, 4  ;;  %s155_s18 = int_to_ptr.hbm [resolvable:$true] %s154_s18 }
   0x9   :  { %181 = vset.pattern.permute.xlu1 %v241_v38  ;;  %182 = vset.pattern.permute.xlu0 %v241_v38  ;;  %v143_v39 = vld [vmem:[%s327_s4] sm:$0xf] }
   0xa   :  { %v69_v16 = vunpack.c.0.s8 %v68_v14  ;;  %v144_v41 = vmul.f32 0.9, %v143_v39  ;;  %v99_v51 = vld [vmem:[%s324_s1] sm:$0xf] }
   0xb   :  { %v123_v55 = vld [vmem:[%s325_s2] sm:$0xf] }
   0xe   :  { %v45_v2 = vld.sshfl [vmem:[#allocation1] sm:$0xff pattern:$0x75316420]  ;;  %v46_v3 = vld.sshfl [vmem:[#allocation1 + $0x8] sm:$0xff pattern:$0x75316420] }
   0xf   :  { %v49_v4 = vld.sshfl [vmem:[#allocation1 + $0x10] sm:$0xff pattern:$0x75316420]  ;;  %v50_v5 = vld.sshfl [vmem:[#allocation1 + $0x18] sm:$0xff pattern:$0x75316420] }
  0x10   :  { %v56_v6 = vsel %vm55_vm0, %v45_v2, 0.0  ;;  %v57_v7 = vsel %vm55_vm0, %v46_v3, 0.0  ;;  %v59_v8 = vsel %vm55_vm0, %v49_v4, 0.0  ;;  %v61_v10 = vsel %vm55_vm0, %v50_v5, 0.0 }
  0x11   :  { %v58_v9 = vadd.f32 %v57_v7, %v56_v6 }
  0x13   :  { %v60_v11 = vadd.f32 %v59_v8, %v58_v9 }
  0x15   :  { %v62_v12 = vadd.f32 %v61_v10, %v60_v11 }
  0x17   :  { %63 = vadd.xlane.f32.xlu0 %v62_v12 }
  0x8a   :  { %v64_v17 = vpop.xlane.xlu0 %63 }
  0x8b   :  { %v65_v19 = vmul.f32 0.001953125, %v64_v17 }
  0x8d   :  { %v70_v20 = vperm.slane %v65_v19, %v69_v16  ;;  %v139_v21 = vmul.f32 0.1, %v65_v19 }
  0x8f   :  { %v72_v22 = vsub.f32 %v40_v0, %v70_v20  ;;  %v73_v23 = vsub.f32 %v41_v1, %v70_v20  ;;  %v140_v24 = vadd.f32 %v139_v21, %v138_v18 }
  0x91   :  { %v74_v25 = vmul.f32 %v72_v22, %v72_v22  ;;  %v75_v26 = vmul.f32 %v73_v23, %v73_v23  ;;  %142 = vst.msk [vmem:[%s329_s6] sm:$0xf] %vm141_vm1, %v140_v24 }
  0x93   :  { %78 = vst [vmem:[#allocation1] ss:$2 sm:$0xff] %v74_v25 }
  0x94   :  { %82 = vst [vmem:[#allocation1 + $0x10] ss:$2 sm:$0xff] %v75_v26 }
  0x9a   :  { %v79_v27 = vld.sshfl [vmem:[#allocation1] sm:$0xff pattern:$0x75316420]  ;;  %v80_v28 = vld.sshfl [vmem:[#allocation1 + $0x8] sm:$0xff pattern:$0x75316420] }
  0x9b   :  { %v83_v29 = vld.sshfl [vmem:[#allocation1 + $0x10] sm:$0xff pattern:$0x75316420]  ;;  %v89_v30 = vsel %vm55_vm0, %v79_v27, 0.0  ;;  %v90_v31 = vsel %vm55_vm0, %v80_v28, 0.0 }
  0x9c   :  { %v84_v32 = vld.sshfl [vmem:[#allocation1 + $0x18] sm:$0xff pattern:$0x75316420]  ;;  %v91_v33 = vadd.f32 %v90_v31, %v89_v30  ;;  %v92_v34 = vsel %vm55_vm0, %v83_v29, 0.0 }
  0x9d   :  { %v94_v36 = vsel %vm55_vm0, %v84_v32, 0.0 }
  0x9e   :  { %v93_v35 = vadd.f32 %v92_v34, %v91_v33 }
  0xa0   :  { %v95_v37 = vadd.f32 %v94_v36, %v93_v35 }
  0xa2   :  { %96 = vadd.xlane.f32.xlu0 %v95_v37 }
 0x115   :  { %v97_v40 = vpop.xlane.xlu0 %96 }
 0x116   :  { %v98_v42 = vmul.f32 0.001953125, %v97_v40 }
 0x118   :  { %v100_v43 = vadd.f32 1e-05, %v98_v42  ;;  %v145_v44 = vmul.f32 0.1, %v98_v42 }
 0x11a   :  { %183 = vrsqrt.f32 %v100_v43  ;;  %v146_v45 = vadd.f32 %v145_v44, %v144_v41  ;;  %vm107_vm3 = vweird.f32 %v100_v43 }
 0x11c   :  { %147 = vst.msk [vmem:[%s330_s7] sm:$0xf] %vm141_vm1, %v146_v45  ;;  %s242_s7 = smov [#allocation5]  }
 0x11d   :  { %s152_s16 = sshll.u32 %s242_s7, 4  ;;  %s153_s16 = int_to_ptr.vmem [resolvable:$true] %s152_s16 }
 0x120   :  { %v184_v46 = vpop.eup %183 }
 0x121   :  { %v102_v47 = vmul.f32 %v184_v46, %v100_v43  ;;  %vm108_vm2 = vweird.f32 %v184_v46 }
 0x122   :  { %vm109_vm4 = vmor %vm107_vm3, %vm108_vm2 }
 0x123   :  { %v103_v48 = vmul.f32 %v184_v46, %v102_v47 }
 0x125   :  { %v104_v49 = vmul.f32 0.5, %v103_v48 }
 0x127   :  { %v105_v50 = vsub.f32 1.5, %v104_v49 }
 0x129   :  { %v106_v52 = vmul.f32 %v184_v46, %v105_v50 }
 0x12b   :  { %v110_v53 = vsel %vm109_vm4, %v184_v46, %v106_v52 }
 0x12c   :  { %v111_v54 = vmul.f32 %v110_v53, %v99_v51 }
 0x12e   :  { %114 = vperm.xlu1 %181, %v111_v54  }
 0x136   :  { %126 = vperm.xlu1 %181, %v123_v55  }
 0x1a0   :  { %v115_v56 = vpop.permute.xlu1 %114 }
 0x1a1   :  { %v119_v57 = vperm.slane %v115_v56, %v69_v16 }
 0x1a3   :  { %v121_v59 = vmul.f32 %v119_v57, %v72_v22  ;;  %v122_v60 = vmul.f32 %v119_v57, %v73_v23 }
 0x1a8   :  { %v127_v58 = vpop.permute.xlu1 %126 }
 0x1a9   :  { %v131_v61 = vperm.slane %v127_v58, %v69_v16 }
 0x1ab   :  { %v133_v62 = vadd.f32 %v131_v61, %v121_v59  ;;  %v134_v63 = vadd.f32 %v131_v61, %v122_v60 }
 0x1ad   :  { %135 = vst [vmem:[#allocation5] sm:$0xff] %v133_v62 }
 0x1ae   :  { %136 = vst [vmem:[#allocation5 + $0x8] sm:$0xff] %v134_v63 }
 0x1af   :  { %160 = dma.vmem_to_hbm [thread:$0]  %s153_s16, 256, %s155_s18, [#allocation4], %s238_s29, %s238_s29, %s239_s30  }
 0x1b0   :  { %235 = dma.done.wait [#allocation4], 256  }
 0x1b1   :  { %236 = vsyncadd [#allocation4], 4294967040 }
 0x1b2   :  { %173 = vsyncpa [#allocation3], 1 }
 0x1b3   :  { %174 = vsyncpa [#allocation4], 1 }

</bundles_post_ra>
